<compile_context>
chip_gen: v7x
topology: tpu7x:2x2x1
jax: 0.10.0
libtpu: 0.0.40
codegen_flags: <defaults>
</compile_context>

<pallas_src>
import functools

import jax
import jax.numpy as jnp
from jax.experimental import pallas as pl
from jax.experimental.pallas import tpu as pltpu

FEAT = 2048          # resnet50 feature dim (fc = Identity)
NUM_CLASSES = 1      # TODO(synk): num_classes > 1 would use an MXU dot for the head.


# ---------------------------------------------------------------------------
# Kernels
# ---------------------------------------------------------------------------
def _fusion_sum_kernel(x_ref, w_ref, bias_ref, out_ref, acc_ref, *,
                       n_total, tile_b, c):
    # x_ref:    [1, tile_b*c, hw]  bf16 — one view's batch tile (C folded into sublanes)
    # w_ref:    [1, tile_b*c, 1]   f32  — modality-selected fused (backbone@head)/HW weight
    # bias_ref: [1, 1]             f32  — all biases + head bias pre-folded
    # acc_ref:  [tile_b*c, 1]      f32  — per-(sample,channel) accumulator
    v = pl.program_id(1)

    @pl.when(v == 0)
    def _init():
        acc_ref[...] = jnp.zeros_like(acc_ref)

    # Fused bf16 load -> f32 spatial sum (lane reduce), then tiny per-row mul-add.
    s = jnp.sum(x_ref[0].astype(jnp.float32), axis=-1, keepdims=True)   # [tile_b*c, 1]
    acc_ref[...] = acc_ref[...] + s * w_ref[0]

    @pl.when(v == n_total - 1)
    def _finalize():
        res = jnp.sum(acc_ref[...].reshape(tile_b, c), axis=-1,
                      keepdims=True) + bias_ref[...]                     # [tile_b, 1]
        out_ref[...] = res.astype(out_ref.dtype)


def _fusion_max_kernel(x_ref, w_bk_ref, b_bk_ref, head_w_ref, head_b_ref,
                       out_ref, acc_hb_ref, acc_sp_ref, *,
                       n_hb, n_total, tile_b, c):
    # x_ref:      [1, tile_b*c, hw]  bf16
    # w_bk_ref:   [1, c, FEAT]       f32 (modality-selected, 1/HW folded in)
    # b_bk_ref:   [1, 1, FEAT]       f32
    # head_w_ref: [2, FEAT]          f32 (0.5 fusion scale folded in)
    # head_b_ref: [1, 1]             f32
    v = pl.program_id(1)

    @pl.when(v == 0)
    def _init():
        acc_hb_ref[...] = jnp.full_like(acc_hb_ref, -jnp.inf)
        acc_sp_ref[...] = jnp.full_like(acc_sp_ref, -jnp.inf)

    gap = jnp.sum(x_ref[0].astype(jnp.float32), axis=-1,
                  keepdims=True).reshape(tile_b, c)                      # [tile_b, c]
    feat = jnp.dot(gap, w_bk_ref[0],
                   preferred_element_type=jnp.float32) + b_bk_ref[0]    # [tile_b, FEAT]

    @pl.when(v < n_hb)
    def _acc_hb():
        acc_hb_ref[...] = jnp.maximum(acc_hb_ref[...], feat)

    @pl.when(v >= n_hb)
    def _acc_sp():
        acc_sp_ref[...] = jnp.maximum(acc_sp_ref[...], feat)

    @pl.when(v == n_total - 1)
    def _finalize():
        hw_rows = head_w_ref[...]
        res = jnp.sum(acc_hb_ref[...] * hw_rows[0:1, :]
                      + acc_sp_ref[...] * hw_rows[1:2, :],
                      axis=-1, keepdims=True) + head_b_ref[...]
        out_ref[...] = res.astype(out_ref.dtype)


# ---------------------------------------------------------------------------
# Tile / VMEM planning (generation-aware, padding-aware)
# ---------------------------------------------------------------------------
def _pad_to(x, m):
    return ((x + m - 1) // m) * m


def _sublane_mult(dtype):
    # (8,128) tiles for f32, (16,128) for bf16 (sub-32-bit packs along sublanes).
    return max(8, 8 * (4 // jnp.dtype(dtype).itemsize))


def _vmem_need(tile_b, c, hw, img_dtype, use_max, n_img_buf=2):
    f32 = 4
    isz = jnp.dtype(img_dtype).itemsize
    rows = tile_b * c
    img = n_img_buf * _pad_to(rows, _sublane_mult(img_dtype)) * _pad_to(hw, 128) * isz
    work = _pad_to(rows, 8) * _pad_to(hw, 128) * f32        # f32 cast/reduce working set
    out = 2 * _pad_to(tile_b, 8) * 128 * f32
    if use_max:
        # double-buffered weight blocks (w_bk, b_bk, head_w, head_b) + FEAT-wide scratch
        weights = 2 * (_pad_to(c, 8) + 8 + _pad_to(2, 8) + 8) * _pad_to(FEAT, 128) * f32
        scratch = 4 * _pad_to(tile_b, 8) * _pad_to(FEAT, 128) * f32   # 2 acc + feat headroom
    else:
        weights = 2 * (_pad_to(rows, 8) + 8) * 128 * f32
        scratch = _pad_to(rows, 8) * 128 * f32
    return img + work + out + weights + scratch


def _tpu_vmem_capacity():
    try:
        return int(pltpu.get_tpu_info().vmem_capacity_bytes)
    except Exception:
        return 64 << 20          # conservative fallback (v7x-sized per-TC VMEM)


def _plan_tiling(b, c, hw, img_dtype, use_max):
    vmem_cap = _tpu_vmem_capacity()
    small_vmem = vmem_cap <= (64 << 20)        # v7x-like: 64 MiB/TC, 2 TCs/chip
    budget = (28 << 20) if small_vmem else (48 << 20)
    max_limit = (40 << 20) if small_vmem else (96 << 20)

    # tile_b must divide B and satisfy the (8,128) sublane rule on the output block.
    cands = sorted((d for d in range(1, b + 1)
                    if b % d == 0 and (d == b or d % 8 == 0)), reverse=True)
    fits = [d for d in cands if _vmem_need(d, c, hw, img_dtype, use_max) <= budget]
    if fits:
        tile_b = fits[0]
        if small_vmem:
            # Keep >= 2 batch tiles so both v7x TensorCores get work on the
            # 'parallel' batch axis (no-op on v5e/v6e beyond a tiny step cost).
            multi = [d for d in fits if b // d >= 2]
            if multi:
                tile_b = multi[0]
    else:
        tile_b = cands[-1]       # smallest legal tile; vmem_limit grows to cover it

    need = _vmem_need(tile_b, c, hw, img_dtype, use_max) + (4 << 20)
    vmem_limit = min(max(need, 16 << 20), max_limit)
    if vmem_limit < need:        # never under-provision; only the physical cap limits us
        vmem_limit = min(need, vmem_cap)
    return tile_b, int(vmem_limit)


# ---------------------------------------------------------------------------
# Wrapper
# ---------------------------------------------------------------------------
def build_multimodel_sharebackbone(hb, sp, params, backbone="hbsp_avgavg",
                                   image_dtype=jnp.bfloat16):
    """hb, sp: [N_views, B, C, H, W] stacks of NCHW images (one entry per view)."""
    n_hb, b, c, h, w = hb.shape
    n_sp = sp.shape[0]
    assert sp.shape[1:] == (b, c, h, w)
    hw = h * w
    n_total = n_hb + n_sp
    use_max = backbone == "hbsp_maxavg"
    hi = jax.lax.Precision.HIGHEST

    # Layout fix: [n_total, B*C, HW] so the (tiny) channel dim lands on sublanes
    # together with batch — bf16 image tiles fully occupy (16,128) vregs/VMEM tiles.
    views = jnp.concatenate(
        [hb.reshape(n_hb, b * c, hw), sp.reshape(n_sp, b * c, hw)], axis=0
    ).astype(image_dtype)                                          # [n_total, B*C, HW]

    tile_b, vmem_limit = _plan_tiling(b, c, hw, views.dtype, use_max)
    grid = (b // tile_b, n_total)                                  # view axis last

    image_spec = pl.BlockSpec((1, tile_b * c, hw), lambda bi, v: (v, bi, 0))
    modality_map3 = lambda bi, v: (jnp.where(v < n_hb, 0, 1), 0, 0)
    out_specs = pl.BlockSpec((tile_b, NUM_CLASSES), lambda bi, v: (bi, 0))

    if not use_max:
        # --- fold the head into the backbone weight (exact up to FP reassociation) ---
        if backbone == "hbsp_avglinear":
            w_lg2 = params["w_lg2"].astype(jnp.float32)            # [2*FEAT, 1]
            h_hb = w_lg2[:FEAT, 0] / n_hb
            h_sp = w_lg2[FEAT:, 0] / n_sp
            head_b = params["b_lg2"].astype(jnp.float32).reshape(())
        else:  # hbsp_avgavg
            w_avg = params["w_avg"].astype(jnp.float32)[:, 0]      # [FEAT]
            h_hb = w_avg * (0.5 / n_hb)
            h_sp = w_avg * (0.5 / n_sp)
            head_b = params["b_avg"].astype(jnp.float32).reshape(())

        w_f_hb = jnp.matmul(params["w_hb"].astype(jnp.float32), h_hb, precision=hi) / hw
        w_f_sp = jnp.matmul(params["w_sp"].astype(jnp.float32), h_sp, precision=hi) / hw
        # Repeat the [C] fused weight per batch sample so it matches the B*C sublane rows.
        w_tiled = jnp.tile(jnp.stack([w_f_hb, w_f_sp]), (1, tile_b))[..., None]  # [2, tile_b*c, 1]
        bias_total = (n_hb * jnp.dot(params["b_hb"].astype(jnp.float32)[0], h_hb, precision=hi)
                      + n_sp * jnp.dot(params["b_sp"].astype(jnp.float32)[0], h_sp, precision=hi)
                      + head_b).reshape(1, 1)

        in_specs = [
            image_spec,
            pl.BlockSpec((1, tile_b * c, 1), modality_map3),       # fused weights
            pl.BlockSpec((1, NUM_CLASSES), lambda bi, v: (0, 0)),  # fused bias (resident)
        ]
        scratch = [pltpu.VMEM((tile_b * c, 1), jnp.float32)]
        kernel = functools.partial(_fusion_sum_kernel,
                                   n_total=n_total, tile_b=tile_b, c=c)
        args = (views, w_tiled, bias_total)
        weight_bytes = (w_tiled.size + 1) * 4
    else:
        # --- max does not commute with the head: keep the FEAT-wide path ---
        w_bk = jnp.stack([params["w_hb"], params["w_sp"]]).astype(jnp.float32) / hw
        b_bk = jnp.stack([params["b_hb"], params["b_sp"]]).astype(jnp.float32)  # [2,1,FEAT]
        w_avg = params["w_avg"].astype(jnp.float32)[:, 0]
        head_w = jnp.stack([w_avg * 0.5, w_avg * 0.5])                          # [2, FEAT]
        head_b = params["b_avg"].astype(jnp.float32).reshape(1, 1)

        in_specs = [
            image_spec,
            pl.BlockSpec((1, c, FEAT), modality_map3),             # backbone W
            pl.BlockSpec((1, 1, FEAT), modality_map3),             # backbone b
            pl.BlockSpec((2, FEAT), lambda bi, v: (0, 0)),         # head W (resident)
            pl.BlockSpec((1, NUM_CLASSES), lambda bi, v: (0, 0)),  # head b (resident)
        ]
        scratch = [pltpu.VMEM((tile_b, FEAT), jnp.float32),
                   pltpu.VMEM((tile_b, FEAT), jnp.float32)]
        kernel = functools.partial(_fusion_max_kernel, n_hb=n_hb, n_total=n_total,
                                   tile_b=tile_b, c=c)
        args = (views, w_bk, b_bk, head_w, head_b)
        weight_bytes = (w_bk.size + b_bk.size + head_w.size + head_b.size) * 4

    # Memory-bound: bytes ~= the streamed image stack; flops are tiny.
    cost = pl.CostEstimate(
        flops=int(2 * n_total * b * c * hw + 2 * n_total * b * c * FEAT),
        transcendentals=0,
        bytes_accessed=int(views.size * views.dtype.itemsize + weight_bytes
                           + b * NUM_CLASSES * 4))

    return pl.pallas_call(
        kernel,
        out_shape=jax.ShapeDtypeStruct((b, NUM_CLASSES), jnp.float32),
        grid_spec=pltpu.PrefetchScalarGridSpec(
            num_scalar_prefetch=0,
            grid=grid,
            in_specs=in_specs,
            out_specs=out_specs,
            scratch_shapes=scratch),
        compiler_params=pltpu.CompilerParams(
            dimension_semantics=("parallel", "arbitrary"),
            vmem_limit_bytes=vmem_limit),
        cost_estimate=cost,
    )(*args)


# ---------------------------------------------------------------------------
# Pure-JAX reference (mirrors the PyTorch forward op order) + params
# ---------------------------------------------------------------------------
def _reference(hb, sp, params, backbone, image_dtype=jnp.float32):
    n_hb, b, c, h, w = hb.shape
    n_sp = sp.shape[0]
    hb32 = hb.astype(image_dtype).astype(jnp.float32)
    sp32 = sp.astype(image_dtype).astype(jnp.float32)
    hb_gap = hb32.reshape(n_hb * b, c, h * w).mean(-1)
    sp_gap = sp32.reshape(n_sp * b, c, h * w).mean(-1)
    hb_feat = (hb_gap @ params["w_hb"] + params["b_hb"]).reshape(n_hb, b, FEAT)
    sp_feat = (sp_gap @ params["w_sp"] + params["b_sp"]).reshape(n_sp, b, FEAT)
    if backbone == "hbsp_maxavg":
        hb_agg, sp_agg = hb_feat.max(0), sp_feat.max(0)
        return ((hb_agg + sp_agg) / 2) @ params["w_avg"] + params["b_avg"]
    hb_agg, sp_agg = hb_feat.sum(0) / n_hb, sp_feat.sum(0) / n_sp
    if backbone == "hbsp_avgavg":
        return ((hb_agg + sp_agg) / 2) @ params["w_avg"] + params["b_avg"]
    return jnp.concatenate([hb_agg, sp_agg], -1) @ params["w_lg2"] + params["b_lg2"]


def init_params(key, c):
    ks = jax.random.split(key, 8)
    s = 0.05
    return {
        # proxy backbone heads (Linear stored pre-transposed: [in, out])
        "w_hb":  jax.random.normal(ks[0], (c, FEAT), jnp.float32) * s,
        "b_hb":  jax.random.normal(ks[1], (1, FEAT), jnp.float32) * s,
        "w_sp":  jax.random.normal(ks[2], (c, FEAT), jnp.float32) * s,
        "b_sp":  jax.random.normal(ks[3], (1, FEAT), jnp.float32) * s,
        # lg2: Linear(2*2048, num_classes)
        "w_lg2": jax.random.normal(ks[4], (2 * FEAT, NUM_CLASSES), jnp.float32) * s,
        "b_lg2": jax.random.normal(ks[5], (1, NUM_CLASSES), jnp.float32) * s,
        # lgavgavg: Linear(2048, num_classes)
        "w_avg": jax.random.normal(ks[6], (FEAT, NUM_CLASSES), jnp.float32) * s,
        "b_avg": jax.random.normal(ks[7], (1, NUM_CLASSES), jnp.float32) * s,
    }


if __name__ == "__main__":
    key = jax.random.PRNGKey(0)
    k_hb, k_sp, k_p = jax.random.split(key, 3)

    N_VIEWS, B, C, H, W = 3, 2, 4, 16, 16
    hb = jax.random.normal(k_hb, (N_VIEWS, B, C, H, W), jnp.float32)
    sp = jax.random.normal(k_sp, (N_VIEWS, B, C, H, W), jnp.float32)
    params = init_params(k_p, C)

    ok = True
    for backbone in ("hbsp_avgavg", "hbsp_avglinear", "hbsp_maxavg"):
        out = jax.block_until_ready(
            build_multimodel_sharebackbone(hb, sp, params, backbone=backbone))
        # Tight check vs. a reference using the same bf16 image quantization
        # (kernel math correct up to FP reassociation of the folded head), plus
        # a loose sanity check vs. the full-f32 reference (bf16 streaming trade).
        ref_bf16 = _reference(hb, sp, params, backbone, image_dtype=jnp.bfloat16)
        ref_f32 = _reference(hb, sp, params, backbone, image_dtype=jnp.float32)
        if out.shape != (B, NUM_CLASSES):
            ok = False
        if not jnp.allclose(out, ref_bf16, atol=3e-3, rtol=3e-3):
            ok = False
        if not jnp.allclose(out, ref_f32, atol=2e-2, rtol=2e-2):
            ok = False

    if ok:
        print("KERNEL_OK")
</pallas_src>

<mosaic_0001>
module attributes {stable_mosaic.version = 11 : i64} {
  func.func @_fusion_sum_kernel(%arg0: i32, %arg1: i32, %arg2: memref<1x8x256xbf16, #tpu.memory_space<vmem>>, %arg3: memref<1x8x1xf32, #tpu.memory_space<vmem>>, %arg4: memref<1x1xf32, #tpu.memory_space<vmem>>, %arg5: memref<2x1xf32, #tpu.memory_space<vmem>>, %arg6: memref<8x1xf32, #tpu.memory_space<vmem>>) attributes {dimension_semantics = [#tpu.dimension_semantics<parallel>, #tpu.dimension_semantics<arbitrary>], iteration_bounds = array<i64: 1, 6>, scalar_prefetch = 0 : i64, scratch_operands = 1 : i64, tpu.core_type = #tpu.core_type<tc>, window_params = [{transform_indices = @transform_0, window_bounds = array<i64: 1, 8, 256>}, {transform_indices = @transform_1, window_bounds = array<i64: 1, 8, 1>}, {pipeline_mode = #tpu.pipeline_mode<synchronous>, transform_indices = @transform_2, window_bounds = array<i64: 1, 1>}, {transform_indices = @transform_3, window_bounds = array<i64: 2, 1>}]} {
    %c0_i32 = arith.constant 0 : i32
    %0 = arith.cmpi eq, %arg1, %c0_i32 : i32
    %1 = arith.extui %0 : i1 to i32
    %c0_i32_0 = arith.constant 0 : i32
    %2 = arith.cmpi ne, %1, %c0_i32_0 : i32
    scf.if %2 {
      %cst_11 = arith.constant 0.000000e+00 : f32
      %17 = vector.broadcast %cst_11 : f32 to vector<8x1xf32>
      %c0_12 = arith.constant 0 : index
      %c0_13 = arith.constant 0 : index
      %18 = vector.load %arg6[%c0_12, %c0_13] : memref<8x1xf32, #tpu.memory_space<vmem>>, vector<8x1xf32>
      tpu.vector_store %arg6[%c0_12, %c0_13], %17 {strides = array<i32>} : memref<8x1xf32, #tpu.memory_space<vmem>>, vector<8x1xf32>,
    } else {
    }
    %c0 = arith.constant 0 : index
    %c0_1 = arith.constant 0 : index
    %c0_2 = arith.constant 0 : index
    %3 = vector.load %arg2[%c0, %c0_1, %c0_2] : memref<1x8x256xbf16, #tpu.memory_space<vmem>>, vector<1x8x256xbf16>
    %4 = vector.shape_cast %3 : vector<1x8x256xbf16> to vector<8x256xbf16>
    %5 = arith.extf %4 : vector<8x256xbf16> to vector<8x256xf32>
    %cst = arith.constant dense<0.000000e+00> : vector<8xf32>
    %6 = vector.multi_reduction <add>, %5, %cst [1] : vector<8x256xf32> to vector<8xf32>
    %7 = vector.shape_cast %6 : vector<8xf32> to vector<8x1xf32>
    %c0_3 = arith.constant 0 : index
    %c0_4 = arith.constant 0 : index
    %8 = vector.load %arg6[%c0_3, %c0_4] : memref<8x1xf32, #tpu.memory_space<vmem>>, vector<8x1xf32>
    %c0_5 = arith.constant 0 : index
    %c0_6 = arith.constant 0 : index
    %c0_7 = arith.constant 0 : index
    %9 = vector.load %arg3[%c0_5, %c0_6, %c0_7] : memref<1x8x1xf32, #tpu.memory_space<vmem>>, vector<1x8x1xf32>
    %10 = vector.shape_cast %9 : vector<1x8x1xf32> to vector<8x1xf32>
    %11 = arith.mulf %7, %10 : vector<8x1xf32>
    %12 = arith.addf %8, %11 : vector<8x1xf32>
    %c0_8 = arith.constant 0 : index
    %c0_9 = arith.constant 0 : index
    %13 = vector.load %arg6[%c0_8, %c0_9] : memref<8x1xf32, #tpu.memory_space<vmem>>, vector<8x1xf32>
    tpu.vector_store %arg6[%c0_8, %c0_9], %12 {strides = array<i32>} : memref<8x1xf32, #tpu.memory_space<vmem>>, vector<8x1xf32>,
    %c5_i32 = arith.constant 5 : i32
    %14 = arith.cmpi eq, %arg1, %c5_i32 : i32
    %15 = arith.extui %14 : i1 to i32
    %c0_i32_10 = arith.constant 0 : i32
    %16 = arith.cmpi ne, %15, %c0_i32_10 : i32
    scf.if %16 {
      %c0_11 = arith.constant 0 : index
      %c0_12 = arith.constant 0 : index
      %17 = vector.load %arg6[%c0_11, %c0_12] : memref<8x1xf32, #tpu.memory_space<vmem>>, vector<8x1xf32>
      %18 = vector.shape_cast %17 : vector<8x1xf32> to vector<2x4xf32>
      %cst_13 = arith.constant dense<0.000000e+00> : vector<2xf32>
      %19 = vector.multi_reduction <add>, %18, %cst_13 [1] : vector<2x4xf32> to vector<2xf32>
      %20 = vector.shape_cast %19 : vector<2xf32> to vector<2x1xf32>
      %c0_14 = arith.constant 0 : index
      %c0_15 = arith.constant 0 : index
      %21 = vector.load %arg4[%c0_14, %c0_15] : memref<1x1xf32, #tpu.memory_space<vmem>>, vector<1x1xf32>
      %22 = vector.broadcast %21 : vector<1x1xf32> to vector<2x1xf32>
      %23 = arith.addf %20, %22 : vector<2x1xf32>
      %c0_16 = arith.constant 0 : index
      %c0_17 = arith.constant 0 : index
      %24 = vector.load %arg5[%c0_16, %c0_17] : memref<2x1xf32, #tpu.memory_space<vmem>>, vector<2x1xf32>
      tpu.vector_store %arg5[%c0_16, %c0_17], %23 {strides = array<i32>} : memref<2x1xf32, #tpu.memory_space<vmem>>, vector<2x1xf32>,
    } else {
    }
    return
  }
  func.func @transform_0(%arg0: i32, %arg1: i32) -> (i32, i32, i32) {
    %c0_i32 = arith.constant 0 : i32
    %c0_i32_0 = arith.constant 0 : i32
    return %arg1, %arg0, %c0_i32 : i32, i32, i32
  }
  func.func @transform_1(%arg0: i32, %arg1: i32) -> (i32, i32, i32) {
    %c3_i32 = arith.constant 3 : i32
    %0 = arith.cmpi slt, %arg1, %c3_i32 : i32
    %c0_i32 = arith.constant 0 : i32
    %c1_i32 = arith.constant 1 : i32
    %1 = arith.select %0, %c0_i32, %c1_i32 : i32
    %c0_i32_0 = arith.constant 0 : i32
    %c0_i32_1 = arith.constant 0 : i32
    %c0_i32_2 = arith.constant 0 : i32
    return %1, %c0_i32_0, %c0_i32_1 : i32, i32, i32
  }
  func.func @transform_2(%arg0: i32, %arg1: i32) -> (i32, i32) {
    %c0_i32 = arith.constant 0 : i32
    %c0_i32_0 = arith.constant 0 : i32
    %c0_i32_1 = arith.constant 0 : i32
    return %c0_i32, %c0_i32_0 : i32, i32
  }
  func.func @transform_3(%arg0: i32, %arg1: i32) -> (i32, i32) {
    %c0_i32 = arith.constant 0 : i32
    %c0_i32_0 = arith.constant 0 : i32
    return %arg0, %c0_i32 : i32, i32
  }
}

</mosaic_0001>

<bundles_post_ra>
// kernel: tpu_custom_call.1
= control target key start
LH: loop header
LB: loop body
LE: loop exit
PB: predicated region body
PF: predicated region fallthrough
CT: control target
= control target key end

     0   :  { %s691_s0 = inlined_call_operand.hbm [shape: bf16[6,8,256], index: 0, kind: input, shape index: {}]   ;;  %s692_s1 = inlined_call_operand.vmem [shape: f32[2,8,1], index: 1, kind: input, shape index: {}]   ;;  %s693_s2 = inlined_call_operand.<no memory space> [shape: f32[1,1], index: 2, kind: input, shape index: {}]   ;;  %s694_s3 = inlined_call_operand.vmem [shape: f32[2,1], index: 3, kind: output, shape index: {}]  }
   0x1   :  { %v8_v0 = vstv %s693_s2 }
   0x2   :  { %9 = vst [vmem:[#allocation3] sm:$0x1] %v8_v0 }
   0x3   :  { %10 = vsyncpa [#allocation5], 0 }
   0x4   :  { %12 = vsyncpa [#allocation5 + $0x1], 0  ;;  %s562_s14 = smov 0   ;;  %s564_s15 = smov 0  }
   0x5   :  { %s566_s16 = smov 0   ;;  %s568_s17 = smov 0  }
   0x6   :  { %s570_s18 = smov 0   ;;  %s572_s19 = smov 0  }
   0x7 LB: > { %s379_s2 = sadd.s32 4294967295, %s534_s19   ;;  %s27_s20 = sadd.s32 1, %s530_s18  ;;  %s534_s19 = sphi %s572_s19, %s18_s19   ;;  %s530_s18 = sphi %s570_s18, %s704_s18   ;;  %s526_s17 = sphi %s568_s17, %s703_s17   ;;  %s522_s16 = sphi %s566_s16, %s702_s16   ;;  %s518_s15 = sphi %s564_s15, %s701_s15   ;;  %s514_s14 = sphi %s562_s14, %s700_s14  }
   0x8   : > { %p28_p0 = scmp.ge.s32.totalorder %s27_s20, 6  ;;  %s39_s21 = sadd.s32 1, %s522_s16 }
   0x9   : > { %p46_p1 = scmp.ne.s32.totalorder %s522_s16, %s518_s15  ;;  %p47_p2 = scmp.eq.s32.totalorder %s534_s19, 0 }
   0xa   : > { %s706_s20 = smov (%p28_p0, %s27_s20), 0  ;;  %p52_p4 = scmp.ne.s32.totalorder %s518_s15, %s514_s14 }
   0xb   : > { %p598_p3 = por %p47_p2, %p46_p1  ;;  %s34_s23 = ssub.s32 %s530_s18, %s706_s20 }
   0xc   : > { %p53_p5 = scmp.eq.s32.totalorder %s379_s2, 0  ;;  %p37_p6 = scmp.eq.s32.totalorder %s34_s23, 0 }
   0xd   : > { %p401_p8 = scmp.lt.s32.totalorder %s534_s19, 6  ;;  %s156_s26 = sand.u32 1, %s522_s16  }
   0xe   : > { %p605_p7 = por %p53_p5, %p52_p4  ;;  %s394_s27 = sshll.u32 %s530_s18, 7 }
   0xf   : > { %s611_s25 = scalar_select %p37_p6, %s522_s16, %s39_s21  }
  0x10   : > { %s382_s28 = sshll.u32 %s156_s26, 3  ;;  %s618_s4 = scalar_lea.hbm %s691_s0, %s394_s27 }
  0x11   : > { %s160_s5 = scalar_lea.vmem [#allocation4], %s382_s28  ;;  %p622_p9 = pnand %p401_p8, %p598_p3 }
  0x12   : > { %s170_s6 = sshll.u32 %s160_s5, 4  ;;  %s157_s8 = scalar_lea.sflag [#allocation5], %s156_s26  ;;  %s626_s6 = int_to_ptr.vmem [resolvable:$true] %s170_s6 }
  0x13   : > { %s454_s9 = scalar_lea.hbm %s618_s4, 128  ;;  %p456_p13 = pneg %p622_p9 }
  0x14   : > { %p455_p12 = scmp.ne.s32.totalorder %s618_s4, %s454_s9  ;;  %s459_s12 = scalar_lea.hbm %s691_s0, 768 }
  0x15   : > { %p460_p2 = scmp.lt.u32.totalorder %s618_s4, %s691_s0  ;;  %p461_p3 = scmp.lt.u32.totalorder %s459_s12, %s454_s9 }
  0x16   : > { %p457_p0 = pnand %p456_p13, %p455_p12  ;;  %p463_p5 = scmp.lt.u32.totalorder %s454_s9, %s618_s4 }
  0x17   : > { %p462_p4 = por %p461_p3, %p460_p2 }
  0x18   : > { %p458_p1 = pneg %p457_p0 }
  0x19   : > { %p464_p6 = por %p463_p5, %p462_p4 }
  0x1b   : > { %p465_p8 = pnand %p464_p6, %p458_p1 }
  0x1d   : > { %468 = shalt.err (!%p465_p8)
}
  0x1e   : > { %s469_s2 = scalar_lea.vmem %s626_s6, 128  ;;  %s536_s21 = smov [#allocation4]  }
  0x1f   : > { %p470_p12 = scmp.ne.s32.totalorder %s626_s6, %s469_s2  ;;  %s474_s22 = sshll.u32 %s536_s21, 4  ;;  %s475_s22 = int_to_ptr.vmem [resolvable:$false] %s474_s22 }
  0x20   : > { %s476_s23 = scalar_lea.vmem %s475_s22, 256  ;;  %p477_p11 = scmp.lt.s32.totalorder %s626_s6, %s475_s22 }
  0x21   : > { %p472_p0 = pnand %p470_p12, %p456_p13  ;;  %p478_p2 = scmp.lt.s32.totalorder %s476_s23, %s469_s2 }
  0x23   : > { %p473_p10 = pneg %p472_p0  ;;  %p479_p3 = por %p478_p2, %p477_p11 }
  0x25   : > { %p480_p4 = pnand %p479_p3, %p473_p10 }
  0x27   : > { %483 = shalt.err (!%p480_p4)
}
  0x28   : > { %400 = dma.hbm_to_vmem [thread:$0]  (!%p622_p9), %s618_s4, 128, %s626_s6, %s157_s8  }
  0x29   : > { %p698_p1 = scmp.lt.s32.totalorder %s534_s19, 7  ;;  %p699_p5 = scmp.ge.s32.totalorder %s534_s19, 1 }
  0x2b   : > { %p187_p13 = pnand %p699_p5, %p698_p1 }
  0x2c   : > { %s192_s26 = sand.u32 (!%p187_p13), 1, %s518_s15  }
  0x2d   : > { %190 = sbr.rel (%p187_p13) target bundleno = 503 (0x1f7), region = 32  ;;  %s386_s27 = sshll.u32 (!%p187_p13), %s192_s26, 3 }
  0x2e   : > { %s193_s28 = scalar_lea.sflag (!%p187_p13), [#allocation5], %s192_s26  ;;  %s196_s29 = scalar_lea.vmem (!%p187_p13), [#allocation4], %s386_s27 }
  0x34   : > { %509 = dma.done.wait (%p605_p7), %s193_s28, 128  }
  0x35   : > { %511 = vsyncadd (%p605_p7), %s193_s28, 4294967168  ;;  %p224_p10 = scmp.ge.s32.totalorder %s526_s17, 3  ;;  %p388_p9 = scmp.ne.s32.totalorder %s526_s17, 0 }
  0x36   : > { %vm240_vm0 = vcmask (!%p388_p9), 7168   ;;  %v537_v1 = vmov (!%p388_p9), 0.0  }
  0x37   : > { %s225_s30 = scalar_select %p224_p10, 1, 0 }
  0x38   : > { %239 = sbr.rel (%p388_p9) target bundleno = 63 (0x3f), region = 40  ;;  %241 = vst.msk [vmem:[#allocation2] sm:$0xff] (!%p388_p9), %vm240_vm0, %v537_v1 }
  0x39   : > { %p226_p11 = scmp.lt.s32.totalorder %s225_s30, 1 }
  0x3b   : > { %s708_s30 = smov (!%p226_p11, %s225_s30), 1 }
  0x3c   : > { %s387_s4 = sshll.u32 %s708_s30, 3 }
  0x3d   : > { %s229_s7 = scalar_lea.vmem %s692_s1, %s387_s4 }
  0x3f PF: > { %v242_v2 = vld [vmem:[%s196_s29] sm:$0xff]  ;;  %v249_v6 = vld [vmem:[%s229_s7] sm:$0xff]  ;;  %vm252_vm1 = vcmask 7168   ;;  %p389_p7 = scmp.ne.s32.totalorder %s526_s17, 5 }
  0x40   : > { %v243_v3 = vunpack.c.l.bf16 %v242_v2  ;;  %v244_v4 = vunpack.c.h.bf16 %v242_v2  ;;  %v248_v8 = vld [vmem:[#allocation2] sm:$0xff]  ;;  %v538_v12 = vmov (!%p389_p7), 0   ;;  %v267_v14 = vlaneseq (!%p389_p7)  ;;  %v390_v24 = vld [vmem:[#allocation3] ss:$0 sm:$0xff] (!%p389_p7) }
  0x41   : > { %452 = vset.pattern.permute.xlu0 (!%p389_p7), %v538_v12  ;;  %vm277_vm2 = vcmask (!%p389_p7), 1041409   ;;  %vm280_vm3 = vcmask (!%p389_p7), 25600   ;;  %vm292_vm4 = vcmask (!%p389_p7), 1024  }
  0x42   : > { %v245_v5 = vadd.f32 %v244_v4, %v243_v3  ;;  %v268_v15 = vand.u32 (!%p389_p7), 127, %v267_v14  ;;  %v270_v16 = vshrl.u32 (!%p389_p7), %v267_v14, 7 }
  0x44   : > { %246 = vadd.xlane.f32.xlu0 %v245_v5  ;;  %v271_v18 = vsub.s32 (!%p389_p7), %v268_v15, %v270_v16 }
  0xd0   : > { %257 = sbr.rel (%p389_p7) target bundleno = 503 (0x1f7), region = 44 }
  0xd1   : > { %v247_v7 = vpop.xlane.xlu0 %246 }
  0xd2   : > { %v250_v9 = vmul.f32 %v249_v6, %v247_v7 }
  0xd4   : > { %v251_v10 = vadd.f32 %v250_v9, %v248_v8 }
  0xd6   : > { %253 = vst.msk [vmem:[#allocation2] sm:$0xff] %vm252_vm1, %v251_v10 }
  0xdd   : > { %v258_v11 = vld [vmem:[#allocation2] sm:$0xff] }
  0xde   : > { %262 = vperm.xlu0 %452, %v258_v11   ;;  %v260_v13 = vcombine.high %v258_v11, %v258_v11 }
  0xe2   : > { %265 = vperm.xlu0 %452, %v260_v13  }
 0x15d   : > { %v263_v17 = vpop.permute.xlu0 %262 }
 0x15e   : > { %v272_v20 = vrot.slane %v263_v17, %v271_v18 }
 0x161   : > { %v266_v19 = vpop.permute.xlu0 %265 }
 0x162   : > { %v276_v21 = vrot.slane %v266_v19, %v271_v18 }
 0x164   : > { %v278_v22 = vsel %vm277_vm2, %v276_v21, %v272_v20 }
 0x165   : > { %v281_v23 = vsel %vm280_vm3, %v278_v22, 0.0 }
 0x166   : > { %282 = vadd.xlane.f32.xlu1 %v281_v23 }
 0x1f3   : > { %v283_v25 = vpop.xlane.xlu1 %282 }
 0x1f4   : > { %v291_v26 = vadd.f32 %v390_v24, %v283_v25 }
 0x1f6   : > { %293 = vst.msk [vmem:[%s694_s3] sm:$0x3] %vm292_vm4, %v291_v26 }
 0x1f7 PF: > { %s18_s19 = sadd.s32 1, %s534_s19   ;;  %s700_s14 = smov %s518_s15 }
 0x1f8   : > { %p15_p6 = scmp.ge.s32.totalorder %s18_s19, 8   ;;  %s701_s15 = smov %s522_s16 }
 0x1f9   : > { %s702_s16 = smov %s611_s25  ;;  %s703_s17 = smov %s530_s18 }
 0x1fa   : > { %s704_s18 = smov %s706_s20  ;;  %17 = sbr.rel (!%p15_p6) target bundleno = 7 (0x7), region = 83 }
 0x201   :  { %313 = vsyncpa [#allocation5], 1 }
 0x202   :  { %315 = vsyncpa [#allocation5 + $0x1], 1 }

</bundles_post_ra>
